<compile_context>
chip_gen: v7x
topology: tpu7x:2x2x1
jax: 0.10.0
libtpu: 0.0.40
codegen_flags: <defaults>
</compile_context>

<pallas_src>
import functools

import jax
import jax.numpy as jnp
from jax.experimental import pallas as pl
from jax.experimental.pallas import tpu as pltpu

NUM_LAYERS = 10
FEATURES = 10
BATCH_TILE = 32768  # lanes (batch rows) per grid block on the large-batch path


# ----------------------------------------------------------------------------
# Layer folding: 10 affine maps -> 1 affine map.  Called inside the outer jit
# so the whole forward is one executable launch.  Hoist it if params are
# static across calls.
# ----------------------------------------------------------------------------
def fold_params(weights, biases):
    """weights: (L, F, F) in->out; biases: (L, 1, F)  ->  (F, F), (1, F)."""
    w_eff = jnp.eye(FEATURES, dtype=jnp.float32)
    b_eff = jnp.zeros((1, FEATURES), dtype=jnp.float32)
    for layer in range(NUM_LAYERS):  # static unroll, 10 tiny 10x10 matmuls
        w = weights[layer]
        w_eff = jnp.dot(w_eff, w, preferred_element_type=jnp.float32)
        b_eff = jnp.dot(b_eff, w, preferred_element_type=jnp.float32) + biases[layer]
    return w_eff, b_eff


# ----------------------------------------------------------------------------
# Pallas kernel: one fused matmul + bias in batch-on-lanes layout.
#   y^T = W_eff^T @ x^T + b_eff^T
# ----------------------------------------------------------------------------
def fused_linear_t_kernel(xt_ref, wt_ref, b_ref, ot_ref):
    # xt_ref: (F, Bt)   wt_ref: (F, F) = W_eff^T   b_ref: (F, 1)   ot_ref: (F, Bt)
    y = jnp.dot(wt_ref[...], xt_ref[...], preferred_element_type=jnp.float32)
    # Bias broadcasts across the lane (batch) axis; stores are lane-dense.
    ot_ref[...] = (y + b_ref[...]).astype(ot_ref.dtype)


def _single_block_call(xt, w_t, b_col):
    # Small batch: one full-array VMEM block, no grid -> no per-step overhead.
    F, B = xt.shape
    return pl.pallas_call(
        fused_linear_t_kernel,
        out_shape=jax.ShapeDtypeStruct((F, B), xt.dtype),
        in_specs=[
            pl.BlockSpec(memory_space=pltpu.MemorySpace.VMEM),
            pl.BlockSpec(memory_space=pltpu.MemorySpace.VMEM),
            pl.BlockSpec(memory_space=pltpu.MemorySpace.VMEM),
        ],
        out_specs=pl.BlockSpec(memory_space=pltpu.MemorySpace.VMEM),
    )(xt, w_t, b_col)


def _gridded_call(xt, w_t, b_col, batch_tile):
    # Large batch: 1-D grid over batch lanes; ragged tail masked by Pallas
    # (no host-side pad/slice passes over HBM).
    F, B = xt.shape
    return pl.pallas_call(
        fused_linear_t_kernel,
        out_shape=jax.ShapeDtypeStruct((F, B), xt.dtype),
        grid=(pl.cdiv(B, batch_tile),),
        in_specs=[
            # Lane-tiled activation: (10, batch_tile); 10 == full sublane dim,
            # batch_tile is a multiple of 128 lanes.
            pl.BlockSpec((F, batch_tile), lambda i: (0, i)),
            # Folded weight / bias: constant block index -> load once, single
            # buffer (no useless double-buffer or re-issued DMA).
            pl.BlockSpec((F, F), lambda i: (0, 0), pipeline_mode=pl.Buffered(1)),
            pl.BlockSpec((F, 1), lambda i: (0, 0), pipeline_mode=pl.Buffered(1)),
        ],
        out_specs=pl.BlockSpec((F, batch_tile), lambda i: (0, i)),
        # Batch blocks are independent -> megacore/2-TC sharding on v7x.
        compiler_params=pltpu.CompilerParams(
            dimension_semantics=("parallel",)
        ),
    )(xt, w_t, b_col)


@functools.partial(jax.jit, static_argnames=("batch_tile",))
def mlp_chain(x, weights, biases, *, batch_tile=BATCH_TILE):
    """Forward pass of MyModule.  x: (B, F) f32 -> (B, F) f32.

    Single launch: fold + layout transposes + Pallas kernel under one jit.
    The batch-size branch is static (shapes are trace-time constants).
    """
    w_eff, b_eff = fold_params(weights, biases)
    w_t = w_eff.T        # (F, F)  so the kernel computes W_eff^T @ x^T
    b_col = b_eff.T      # (F, 1)  broadcast over batch lanes
    xt = x.T             # (F, B)  batch on lanes (layout plumbing inside the jit)

    B = x.shape[0]
    if B <= batch_tile:
        yt = _single_block_call(xt, w_t, b_col)
    else:
        yt = _gridded_call(xt, w_t, b_col, batch_tile)
    return yt.T          # back to module-facing (B, F)
    # TODO(synk): callers that keep activations feature-major (F, B) can call
    # _single_block_call/_gridded_call directly and skip both transposes.


# ----------------------------------------------------------------------------
# Parameter init (mimics nn.Linear's U(-1/sqrt(fan_in), 1/sqrt(fan_in))) and a
# pure-JAX reference that applies the 10 layers one-by-one (original order).
# ----------------------------------------------------------------------------
def init_params(key):
    kw, kb = jax.random.split(key)
    bound = 1.0 / jnp.sqrt(jnp.float32(FEATURES))
    # PyTorch stores weight as (out, in); we store pre-transposed (in, out).
    w_torch = jax.random.uniform(
        kw, (NUM_LAYERS, FEATURES, FEATURES), jnp.float32, -bound, bound
    )
    weights = jnp.swapaxes(w_torch, -1, -2)  # (L, in, out)
    biases = jax.random.uniform(
        kb, (NUM_LAYERS, 1, FEATURES), jnp.float32, -bound, bound
    )
    return weights, biases


def reference(x, weights, biases):
    out = x
    for layer in range(NUM_LAYERS):
        out = out @ weights[layer] + biases[layer]
    return out


if __name__ == "__main__":
    key = jax.random.PRNGKey(0)
    k_x, k_p, k_big = jax.random.split(key, 3)

    weights, biases = init_params(k_p)

    # Small-batch path (the shape implied by the module: (8, 10)), no grid.
    batch = 8
    x = jax.random.normal(k_x, (batch, FEATURES), jnp.float32)
    out = jax.block_until_ready(mlp_chain(x, weights, biases))
    ref = reference(x, weights, biases)
    assert out.shape == (batch, FEATURES)
    assert jnp.allclose(out, ref, atol=1e-4, rtol=1e-4)

    # Gridded path: small shapes, but a reduced batch_tile exercises the batch
    # grid, the ragged (masked) last block, Buffered(1) weights and the
    # "parallel" dimension semantics.
    big_batch = 1029
    x_big = jax.random.normal(k_big, (big_batch, FEATURES), jnp.float32)
    out_big = jax.block_until_ready(
        mlp_chain(x_big, weights, biases, batch_tile=256)
    )
    ref_big = reference(x_big, weights, biases)
    assert out_big.shape == (big_batch, FEATURES)
    assert jnp.allclose(out_big, ref_big, atol=1e-4, rtol=1e-4)

    print("KERNEL_OK")
</pallas_src>

<mosaic_0001>
module attributes {stable_mosaic.version = 11 : i64} {
  func.func @fused_linear_t_kernel(%arg0: memref<10x8xf32, #tpu.memory_space<vmem>>, %arg1: memref<10x10xf32, #tpu.memory_space<vmem>>, %arg2: memref<10x1xf32, #tpu.memory_space<vmem>>, %arg3: memref<10x8xf32, #tpu.memory_space<vmem>>) attributes {dimension_semantics = [], scalar_prefetch = 0 : i64, scratch_operands = 0 : i64, tpu.core_type = #tpu.core_type<tc>} {
    %c0 = arith.constant 0 : index
    %c0_0 = arith.constant 0 : index
    %0 = vector.load %arg1[%c0, %c0_0] : memref<10x10xf32, #tpu.memory_space<vmem>>, vector<10x10xf32>
    %c0_1 = arith.constant 0 : index
    %c0_2 = arith.constant 0 : index
    %1 = vector.load %arg0[%c0_1, %c0_2] : memref<10x8xf32, #tpu.memory_space<vmem>>, vector<10x8xf32>
    %cst = arith.constant dense<0.000000e+00> : vector<10x8xf32>
    %2 = tpu.matmul %0, %1, %cst {dimension_numbers = #tpu.dot_dimension_numbers<[1], [0], [0], [1], [0, 0, 1, 1], [], []>} : vector<10x10xf32>, vector<10x8xf32>, vector<10x8xf32> -> vector<10x8xf32>
    %c0_3 = arith.constant 0 : index
    %c0_4 = arith.constant 0 : index
    %3 = vector.load %arg2[%c0_3, %c0_4] : memref<10x1xf32, #tpu.memory_space<vmem>>, vector<10x1xf32>
    %4 = vector.broadcast %3 : vector<10x1xf32> to vector<10x8xf32>
    %5 = arith.addf %2, %4 : vector<10x8xf32>
    %c0_5 = arith.constant 0 : index
    %c0_6 = arith.constant 0 : index
    %6 = vector.load %arg3[%c0_5, %c0_6] : memref<10x8xf32, #tpu.memory_space<vmem>>, vector<10x8xf32>
    tpu.vector_store %arg3[%c0_5, %c0_6], %5 {strides = array<i32>} : memref<10x8xf32, #tpu.memory_space<vmem>>, vector<10x8xf32>,
    return
  }
}

</mosaic_0001>

<bundles_post_ra>
// kernel: mlp_chain.1
= control target key start
LH: loop header
LB: loop body
LE: loop exit
PB: predicated region body
PF: predicated region fallthrough
CT: control target
= control target key end

     0   :  { %vm37_vm0 = vcmask 1041408   ;;  %vm30_vm1 = vcmask 80896   ;;  %vm147_vm2 = vmmov 1   ;;  %v148_v2 = vmov 0   ;;  %s195_s0 = inlined_call_operand.vmem [shape: f32[10,8], index: 0, kind: input, shape index: {}]   ;;  %s196_s1 = inlined_call_operand.vmem [shape: f32[10,10], index: 1, kind: input, shape index: {}]   ;;  %s197_s2 = inlined_call_operand.vmem [shape: f32[10,1], index: 2, kind: input, shape index: {}]   ;;  %s198_s3 = inlined_call_operand.vmem [shape: f32[10,8], index: 3, kind: output, shape index: {}]  }
   0x1   :  { %v16_v0 = vld [vmem:[%s195_s0] sm:$0xff]  ;;  %v17_v1 = vld [vmem:[%s195_s0 + $0x8] sm:$0x3]  ;;  %vm139_vm3 = vmpackc.low %vm37_vm0, %vm147_vm2  ;;  %146 = vset.pattern.permute.xlu0 %v148_v2  ;;  %vm118_vm4 = vcmask 58368   ;;  %vm116_vm5 = vcmask 64512  }
   0x2   :  { %v138_v3 = vpack.c.bf16 %v17_v1, %v16_v0  ;;  %v14_v4 = vld [vmem:[%s196_s1] sm:$0xff]  ;;  %v19_v6 = vld [vmem:[%s197_s2 + $0x8] sm:$0x3] }
   0x3   :  { %v18_v5 = vld [vmem:[%s197_s2] sm:$0xff]  ;;  %135 = vmatprep.mubr.msk.f32.mxu0 %vm30_vm1, %v14_v4  ;;  %v15_v7 = vld [vmem:[%s196_s1 + $0x8] sm:$0x3] }
   0x4   :  { %22 = vperm.xlu0 %146, %v18_v5   ;;  %140 = vmatprep.subr.msk.bf16.mxu0 %vm139_vm3, %v138_v3 }
   0x5   :  { %143 = vmatpush3.bf16.msk.msra.mxu0 %vm139_vm3, %v138_v3 }
   0x8   :  { %27 = vperm.xlu0 %146, %v19_v6   ;;  %136 = vmatmul.mubr.msk.f32.vlgmr.msra.gmra.mrb[0].mxu0 %vm30_vm1, %v15_v7 }
  0x83   :  { %v23_v8 = vpop.permute.xlu0 %22 }
  0x87   :  { %v28_v9 = vpop.permute.xlu0 %27 }
  0xdb   :  { %v137_v10 = vpop.f32.mrb[0].mxu0 }
  0xdc   :  { %v113_v11 = vadd.f32 %v137_v10, %v28_v9  ;;  %v107_v12 = vpop.f32.mrb[1].mxu0 }
  0xdd   :  { %v108_v13 = vadd.f32 %v107_v12, %v23_v8 }
  0xde   :  { %119 = vst.msk [vmem:[%s198_s3 + $0x8] sm:$0x3] %vm118_vm4, %v113_v11 }
  0xdf   :  { %117 = vst.msk [vmem:[%s198_s3] sm:$0xff] %vm116_vm5, %v108_v13 }

</bundles_post_ra>
